<compile_context>
chip_gen: v7x
topology: tpu7x:2x2x1
jax: 0.10.0
libtpu: 0.0.40
codegen_flags: <defaults>
</compile_context>

<pallas_src>
import jax
import jax.numpy as jnp
from jax.experimental import pallas as pl
from jax.experimental.pallas import tpu as pltpu

NUM_LAYERS = 4
C = 8
KH = KW = 3


def cnn_kernel(shift_ref, w_ref, x_ref, out_ref):
    # shift_ref: (2, R, R)        [0] = down-shift (row r <- r-1), [1] = up-shift (row r <- r+1);
    #            block-diagonal per image, zero rows at image borders (= zero padding in H).
    # w_ref    : (KH*W*C, W*C)    fused block-banded weights [B_ky0; B_ky1; B_ky2]
    #            (encode the kx taps, the channel mixing and the zero padding in W).
    # x_ref    : (R, W*C)         folded activations, R = (batch tile)*H, lane axis 128 wide.
    # out_ref  : (R, W*C)
    x = x_ref[...]
    s_dn = shift_ref[0]
    s_up = shift_ref[1]
    w = w_ref[...]
    for _ in range(NUM_LAYERS):                              # identical weights every layer
        x_dn = jnp.dot(s_dn, x, preferred_element_type=jnp.float32)   # rows from h-1 (ky=0)
        x_up = jnp.dot(s_up, x, preferred_element_type=jnp.float32)   # rows from h+1 (ky=2)
        xcat = jnp.concatenate([x_dn, x, x_up], axis=1)      # (R, 3*W*C), 128-lane aligned pieces
        x = jnp.maximum(                                     # conv (all ky/kx taps) + ReLU
            jnp.dot(xcat, w, preferred_element_type=jnp.float32), 0.0)
    out_ref[...] = x.astype(out_ref.dtype)


def make_band_weights(w_oihw, width):
    """(Cout, Cin, 3, 3) conv weights -> (3*W*C, W*C) fused per-ky block-banded matmul weights."""
    cin = w_oihw.shape[1]
    bands = []
    for ky in range(KH):
        b = jnp.zeros((width * cin, width * cin), jnp.float32)
        for kx in range(KW):
            blk = w_oihw[:, :, ky, kx].T                     # (Cin, Cout)
            # block (w_in, w_out) is nonzero when w_in - w_out == kx - 1; the band structure also
            # gives the zero padding at the left/right image borders for free.
            b = b + jnp.kron(jnp.eye(width, k=1 - kx, dtype=jnp.float32), blk)
        bands.append(b)
    return jnp.concatenate(bands, axis=0)                    # (3*W*C, W*C)


def make_shift_mats(nb, h):
    """0/1 matrices applying the +-1 vertical shift (with zero padding) per image block."""
    s_dn = jnp.kron(jnp.eye(nb, dtype=jnp.float32), jnp.eye(h, k=-1, dtype=jnp.float32))
    s_up = jnp.kron(jnp.eye(nb, dtype=jnp.float32), jnp.eye(h, k=1, dtype=jnp.float32))
    return jnp.stack([s_dn, s_up])                           # (2, nb*h, nb*h)


def _pick_batch_tile(n, h, max_rows=512):
    # Whole batch in one grid step for small problems; tile (and parallelize) larger batches.
    nb = max(1, min(n, max_rows // h))
    while n % nb:
        nb -= 1
    return nb


@jax.jit
def cnn_forward(x_nchw, w_oihw):
    n, cin, h, w = x_nchw.shape
    wc = w * cin                                             # 16*8 = 128 -> lane-dense
    # NCHW -> NHWC -> (N*H, W*C): channels fold onto the 128-wide lane axis.
    x_folded = jnp.transpose(x_nchw, (0, 2, 3, 1)).reshape(n * h, wc).astype(jnp.float32)

    # Same conv weights for every layer (as in the PyTorch module) -> pass one shared copy.
    w_fused = make_band_weights(w_oihw, w)                   # (3*WC, WC)

    nb = _pick_batch_tile(n, h)                              # nb = n -> grid=(1,) here
    r = nb * h
    shifts = make_shift_mats(nb, h)                          # (2, R, R)

    steps = n // nb
    flops = NUM_LAYERS * steps * (2 * 2 * r * r * wc + 2 * r * (KH * wc) * wc)
    bytes_accessed = (x_folded.size + n * h * wc + w_fused.size + shifts.size) * 4

    out_folded = pl.pallas_call(
        cnn_kernel,
        out_shape=jax.ShapeDtypeStruct((n * h, wc), jnp.float32),
        grid_spec=pltpu.PrefetchScalarGridSpec(
            num_scalar_prefetch=0,
            grid=(steps,),
            in_specs=[
                pl.BlockSpec((2, r, r), lambda b: (0, 0, 0)),
                pl.BlockSpec((KH * wc, wc), lambda b: (0, 0)),
                pl.BlockSpec((r, wc), lambda b: (b, 0)),
            ],
            out_specs=pl.BlockSpec((r, wc), lambda b: (b, 0)),
        ),
        compiler_params=pltpu.CompilerParams(
            # batch-tile axis is embarrassingly parallel (lets v7x shard steps across its
            # 2 TensorCores when the batch is tiled into multiple steps).
            dimension_semantics=("parallel",),
        ),
        cost_estimate=pl.CostEstimate(
            flops=flops, transcendentals=0, bytes_accessed=bytes_accessed),
    )(shifts, w_fused, x_folded)

    # back to NCHW (PyTorch layout)
    return jnp.transpose(out_folded.reshape(n, h, w, cin), (0, 3, 1, 2))


def ref_forward(x_nchw, w_oihw):
    # Pure-JAX reference matching F.conv2d(..., padding=1, bias=None) + ReLU, 4 layers.
    y = x_nchw.astype(jnp.float32)
    for _ in range(NUM_LAYERS):
        y = jax.lax.conv_general_dilated(
            y, w_oihw, window_strides=(1, 1), padding=[(1, 1), (1, 1)],
            dimension_numbers=("NCHW", "OIHW", "NCHW"))
        y = jnp.maximum(y, 0.0)
    return y


if __name__ == "__main__":
    key = jax.random.PRNGKey(0)
    x = jax.random.normal(key, (2, C, 16, 16), dtype=jnp.float32)       # NCHW like PyTorch
    w_oihw = jnp.full((C, C, KH, KW), 1.0 / 9.0, dtype=jnp.float32)     # all 1/9, no bias

    out = jax.block_until_ready(cnn_forward(x, w_oihw))
    ref = jax.block_until_ready(ref_forward(x, w_oihw))

    assert out.shape == ref.shape == (2, C, 16, 16)
    assert jnp.allclose(out, ref, atol=1e-3, rtol=1e-3), float(jnp.max(jnp.abs(out - ref)))
    print("KERNEL_OK")
</pallas_src>

<mosaic_0001>
module attributes {stable_mosaic.version = 11 : i64} {
  func.func @cnn_kernel(%arg0: i32, %arg1: memref<2x32x32xf32, #tpu.memory_space<vmem>>, %arg2: memref<384x128xf32, #tpu.memory_space<vmem>>, %arg3: memref<32x128xf32, #tpu.memory_space<vmem>>, %arg4: memref<32x128xf32, #tpu.memory_space<vmem>>) attributes {dimension_semantics = [#tpu.dimension_semantics<parallel>], iteration_bounds = array<i64: 1>, scalar_prefetch = 0 : i64, scratch_operands = 0 : i64, tpu.core_type = #tpu.core_type<tc>, window_params = [{pipeline_mode = #tpu.pipeline_mode<synchronous>, transform_indices = @transform_0, window_bounds = array<i64: 2, 32, 32>}, {pipeline_mode = #tpu.pipeline_mode<synchronous>, transform_indices = @transform_1, window_bounds = array<i64: 384, 128>}, {transform_indices = @transform_2, window_bounds = array<i64: 32, 128>}, {transform_indices = @transform_3, window_bounds = array<i64: 32, 128>}]} {
    %c0 = arith.constant 0 : index
    %c0_0 = arith.constant 0 : index
    %0 = vector.load %arg3[%c0, %c0_0] : memref<32x128xf32, #tpu.memory_space<vmem>>, vector<32x128xf32>
    %c0_1 = arith.constant 0 : index
    %c0_2 = arith.constant 0 : index
    %c0_3 = arith.constant 0 : index
    %1 = vector.load %arg1[%c0_1, %c0_2, %c0_3] : memref<2x32x32xf32, #tpu.memory_space<vmem>>, vector<1x32x32xf32>
    %2 = vector.shape_cast %1 : vector<1x32x32xf32> to vector<32x32xf32>
    %c1 = arith.constant 1 : index
    %c0_4 = arith.constant 0 : index
    %c0_5 = arith.constant 0 : index
    %3 = vector.load %arg1[%c1, %c0_4, %c0_5] : memref<2x32x32xf32, #tpu.memory_space<vmem>>, vector<1x32x32xf32>
    %4 = vector.shape_cast %3 : vector<1x32x32xf32> to vector<32x32xf32>
    %c0_6 = arith.constant 0 : index
    %c0_7 = arith.constant 0 : index
    %5 = vector.load %arg2[%c0_6, %c0_7] : memref<384x128xf32, #tpu.memory_space<vmem>>, vector<384x128xf32>
    %cst = arith.constant dense<0.000000e+00> : vector<32x128xf32>
    %6 = tpu.matmul %2, %0, %cst {dimension_numbers = #tpu.dot_dimension_numbers<[1], [0], [0], [1], [0, 0, 1, 1], [], []>} : vector<32x32xf32>, vector<32x128xf32>, vector<32x128xf32> -> vector<32x128xf32>
    %cst_8 = arith.constant dense<0.000000e+00> : vector<32x128xf32>
    %7 = tpu.matmul %4, %0, %cst_8 {dimension_numbers = #tpu.dot_dimension_numbers<[1], [0], [0], [1], [0, 0, 1, 1], [], []>} : vector<32x32xf32>, vector<32x128xf32>, vector<32x128xf32> -> vector<32x128xf32>
    %8 = tpu.concatenate %6, %0, %7 in 1 : vector<32x128xf32>, vector<32x128xf32>, vector<32x128xf32> -> vector<32x384xf32>
    %cst_9 = arith.constant dense<0.000000e+00> : vector<32x128xf32>
    %9 = tpu.matmul %8, %5, %cst_9 {dimension_numbers = #tpu.dot_dimension_numbers<[1], [0], [0], [1], [0, 0, 1, 1], [], []>} : vector<32x384xf32>, vector<384x128xf32>, vector<32x128xf32> -> vector<32x128xf32>
    %cst_10 = arith.constant 0.000000e+00 : f32
    %10 = vector.broadcast %cst_10 : f32 to vector<32x128xf32>
    %11 = arith.maximumf %9, %10 : vector<32x128xf32>
    %cst_11 = arith.constant dense<0.000000e+00> : vector<32x128xf32>
    %12 = tpu.matmul %2, %11, %cst_11 {dimension_numbers = #tpu.dot_dimension_numbers<[1], [0], [0], [1], [0, 0, 1, 1], [], []>} : vector<32x32xf32>, vector<32x128xf32>, vector<32x128xf32> -> vector<32x128xf32>
    %cst_12 = arith.constant dense<0.000000e+00> : vector<32x128xf32>
    %13 = tpu.matmul %4, %11, %cst_12 {dimension_numbers = #tpu.dot_dimension_numbers<[1], [0], [0], [1], [0, 0, 1, 1], [], []>} : vector<32x32xf32>, vector<32x128xf32>, vector<32x128xf32> -> vector<32x128xf32>
    %14 = tpu.concatenate %12, %11, %13 in 1 : vector<32x128xf32>, vector<32x128xf32>, vector<32x128xf32> -> vector<32x384xf32>
    %cst_13 = arith.constant dense<0.000000e+00> : vector<32x128xf32>
    %15 = tpu.matmul %14, %5, %cst_13 {dimension_numbers = #tpu.dot_dimension_numbers<[1], [0], [0], [1], [0, 0, 1, 1], [], []>} : vector<32x384xf32>, vector<384x128xf32>, vector<32x128xf32> -> vector<32x128xf32>
    %cst_14 = arith.constant 0.000000e+00 : f32
    %16 = vector.broadcast %cst_14 : f32 to vector<32x128xf32>
    %17 = arith.maximumf %15, %16 : vector<32x128xf32>
    %cst_15 = arith.constant dense<0.000000e+00> : vector<32x128xf32>
    %18 = tpu.matmul %2, %17, %cst_15 {dimension_numbers = #tpu.dot_dimension_numbers<[1], [0], [0], [1], [0, 0, 1, 1], [], []>} : vector<32x32xf32>, vector<32x128xf32>, vector<32x128xf32> -> vector<32x128xf32>
    %cst_16 = arith.constant dense<0.000000e+00> : vector<32x128xf32>
    %19 = tpu.matmul %4, %17, %cst_16 {dimension_numbers = #tpu.dot_dimension_numbers<[1], [0], [0], [1], [0, 0, 1, 1], [], []>} : vector<32x32xf32>, vector<32x128xf32>, vector<32x128xf32> -> vector<32x128xf32>
    %20 = tpu.concatenate %18, %17, %19 in 1 : vector<32x128xf32>, vector<32x128xf32>, vector<32x128xf32> -> vector<32x384xf32>
    %cst_17 = arith.constant dense<0.000000e+00> : vector<32x128xf32>
    %21 = tpu.matmul %20, %5, %cst_17 {dimension_numbers = #tpu.dot_dimension_numbers<[1], [0], [0], [1], [0, 0, 1, 1], [], []>} : vector<32x384xf32>, vector<384x128xf32>, vector<32x128xf32> -> vector<32x128xf32>
    %cst_18 = arith.constant 0.000000e+00 : f32
    %22 = vector.broadcast %cst_18 : f32 to vector<32x128xf32>
    %23 = arith.maximumf %21, %22 : vector<32x128xf32>
    %cst_19 = arith.constant dense<0.000000e+00> : vector<32x128xf32>
    %24 = tpu.matmul %2, %23, %cst_19 {dimension_numbers = #tpu.dot_dimension_numbers<[1], [0], [0], [1], [0, 0, 1, 1], [], []>} : vector<32x32xf32>, vector<32x128xf32>, vector<32x128xf32> -> vector<32x128xf32>
    %cst_20 = arith.constant dense<0.000000e+00> : vector<32x128xf32>
    %25 = tpu.matmul %4, %23, %cst_20 {dimension_numbers = #tpu.dot_dimension_numbers<[1], [0], [0], [1], [0, 0, 1, 1], [], []>} : vector<32x32xf32>, vector<32x128xf32>, vector<32x128xf32> -> vector<32x128xf32>
    %26 = tpu.concatenate %24, %23, %25 in 1 : vector<32x128xf32>, vector<32x128xf32>, vector<32x128xf32> -> vector<32x384xf32>
    %cst_21 = arith.constant dense<0.000000e+00> : vector<32x128xf32>
    %27 = tpu.matmul %26, %5, %cst_21 {dimension_numbers = #tpu.dot_dimension_numbers<[1], [0], [0], [1], [0, 0, 1, 1], [], []>} : vector<32x384xf32>, vector<384x128xf32>, vector<32x128xf32> -> vector<32x128xf32>
    %cst_22 = arith.constant 0.000000e+00 : f32
    %28 = vector.broadcast %cst_22 : f32 to vector<32x128xf32>
    %29 = arith.maximumf %27, %28 : vector<32x128xf32>
    %c0_23 = arith.constant 0 : index
    %c0_24 = arith.constant 0 : index
    %30 = vector.load %arg4[%c0_23, %c0_24] : memref<32x128xf32, #tpu.memory_space<vmem>>, vector<32x128xf32>
    tpu.vector_store %arg4[%c0_23, %c0_24], %29 {strides = array<i32>} : memref<32x128xf32, #tpu.memory_space<vmem>>, vector<32x128xf32>,
    return
  }
  func.func @transform_0(%arg0: i32) -> (i32, i32, i32) {
    %c0_i32 = arith.constant 0 : i32
    %c0_i32_0 = arith.constant 0 : i32
    %c0_i32_1 = arith.constant 0 : i32
    %c0_i32_2 = arith.constant 0 : i32
    return %c0_i32, %c0_i32_0, %c0_i32_1 : i32, i32, i32
  }
  func.func @transform_1(%arg0: i32) -> (i32, i32) {
    %c0_i32 = arith.constant 0 : i32
    %c0_i32_0 = arith.constant 0 : i32
    %c0_i32_1 = arith.constant 0 : i32
    return %c0_i32, %c0_i32_0 : i32, i32
  }
  func.func @transform_2(%arg0: i32) -> (i32, i32) {
    %c0_i32 = arith.constant 0 : i32
    %c0_i32_0 = arith.constant 0 : i32
    return %arg0, %c0_i32 : i32, i32
  }
  func.func @transform_3(%arg0: i32) -> (i32, i32) {
    %c0_i32 = arith.constant 0 : i32
    %c0_i32_0 = arith.constant 0 : i32
    return %arg0, %c0_i32 : i32, i32
  }
}

</mosaic_0001>

<bundles_post_ra>
// kernel: cnn_forward.1
= control target key start
LH: loop header
LB: loop body
LE: loop exit
PB: predicated region body
PF: predicated region fallthrough
CT: control target
= control target key end

     0   :  { %vm75_vm0 = vcmask 261120   ;;  %s2947_s2 = inlined_call_operand.vmem [shape: f32[32,128], index: 2, kind: input, shape index: {}]   ;;  %s2948_s0 = inlined_call_operand.vmem [shape: f32[2,32,32], index: 0, kind: input, shape index: {}]   ;;  %s2949_s1 = inlined_call_operand.vmem [shape: f32[384,128], index: 1, kind: input, shape index: {}]   ;;  %s2950_s3 = inlined_call_operand.vmem [shape: f32[32,128], index: 3, kind: output, shape index: {}]  }
   0x1   :  { %v2447_v0 = vld [vmem:[%s2947_s2] sm:$0xff]  ;;  %v2452_v1 = vld [vmem:[%s2947_s2 + $0x8] sm:$0xff]  ;;  %v2457_v2 = vld [vmem:[%s2947_s2 + $0x10] sm:$0xff] }
   0x2   :  { %v2104_v3 = vpack.c.bf16 %v2452_v1, %v2447_v0  ;;  %v2464_v4 = vld [vmem:[%s2947_s2 + $0x18] sm:$0xff]  ;;  %v2469_v5 = vld [vmem:[%s2948_s0] sm:$0xff]  ;;  %v44_v9 = vld [vmem:[%s2949_s1 + $0x88] sm:$0xff] }
   0x3   :  { %v2108_v6 = vpack.c.bf16 %v2464_v4, %v2457_v2  ;;  %1848 = vmatprep.mubr.msk.f32.mxu0 %vm75_vm0, %v2469_v5  ;;  %v2478_v7 = vld [vmem:[%s2948_s0 + $0x20] sm:$0xff]  ;;  %v60_v12 = vld [vmem:[%s2949_s1 + $0x108] sm:$0xff]  ;;  %v45_v16 = vld [vmem:[%s2949_s1 + $0x90] sm:$0xff] }
   0x4   :  { %2105 = vmatprep.subr.bf16.mxu0 %v2104_v3  ;;  %2113 = vmatprep.subr.bf16.mxu1 %v2104_v3  ;;  %v43_v8 = vld [vmem:[%s2949_s1 + $0x80] sm:$0xff]  ;;  %v28_v14 = vld [vmem:[%s2949_s1 + $0x8] sm:$0xff]  ;;  %v46_v17 = vld [vmem:[%s2949_s1 + $0x98] sm:$0xff] }
   0x5   :  { %2107 = vmatpush3.bf16.msra.mxu0 %v2104_v3  ;;  %2115 = vmatpush3.bf16.msra.mxu1 %v2104_v3  ;;  %v2486_v10 = vpack.c.bf16 %v44_v9, %v43_v8  ;;  %v59_v11 = vld [vmem:[%s2949_s1 + $0x100] sm:$0xff]  ;;  %v61_v18 = vld [vmem:[%s2949_s1 + $0x110] sm:$0xff]  ;;  %v62_v19 = vld [vmem:[%s2949_s1 + $0x118] sm:$0xff]  ;;  %v2540_v25 = vpack.c.bf16 %v46_v17, %v45_v16 }
   0x6   :  { %2109 = vmatprep.subr.bf16.mxu0 %v2108_v6  ;;  %2117 = vmatprep.subr.bf16.mxu1 %v2108_v6  ;;  %v27_v13 = vld [vmem:[%s2949_s1] sm:$0xff]  ;;  %v2502_v15 = vpack.c.bf16 %v60_v12, %v59_v11  ;;  %v2519_v20 = vld [vmem:[%s2948_s0 + $0x8] sm:$0xff]  ;;  %v2529_v22 = vld [vmem:[%s2948_s0 + $0x10] sm:$0xff]  ;;  %v2548_v28 = vpack.c.bf16 %v62_v19, %v61_v18 }
   0x7   :  { %1862 = vmatprep.mubr.msk.f32.mxu1 %vm75_vm0, %v2478_v7  ;;  %v2524_v21 = vld [vmem:[%s2948_s0 + $0x28] sm:$0xff]  ;;  %v2534_v23 = vld [vmem:[%s2948_s0 + $0x30] sm:$0xff]  ;;  %v2537_v24 = vpack.c.bf16 %v28_v14, %v27_v13  ;;  %v30_v27 = vld [vmem:[%s2949_s1 + $0x18] sm:$0xff] }
   0x8   :  { %v29_v26 = vld [vmem:[%s2949_s1 + $0x10] sm:$0xff]  ;;  %v47_v29 = vld [vmem:[%s2949_s1 + $0xa0] sm:$0xff]  ;;  %v48_v30 = vld [vmem:[%s2949_s1 + $0xa8] sm:$0xff] }
   0x9   :  { %2111 = vmatpush3.bf16.msra.mxu0 %v2108_v6  ;;  %2119 = vmatpush3.bf16.msra.mxu1 %v2108_v6  ;;  %v63_v31 = vld [vmem:[%s2949_s1 + $0x120] sm:$0xff]  ;;  %v64_v32 = vld [vmem:[%s2949_s1 + $0x128] sm:$0xff]  ;;  %v2571_v33 = vld [vmem:[%s2948_s0 + $0x18] sm:$0xff]  ;;  %v2582_v35 = vpack.c.bf16 %v30_v27, %v29_v26  ;;  %v2586_v36 = vpack.c.bf16 %v48_v30, %v47_v29 }
   0xa   :  { %2121 = vmatprep.subr.bf16.mxu0 %v2486_v10  ;;  %2153 = vmatprep.subr.bf16.mxu1 %v2502_v15  ;;  %v2578_v34 = vld [vmem:[%s2948_s0 + $0x38] sm:$0xff]  ;;  %v31_v37 = vld [vmem:[%s2949_s1 + $0x20] sm:$0xff]  ;;  %v32_v38 = vld [vmem:[%s2949_s1 + $0x28] sm:$0xff]  ;;  %v2594_v39 = vpack.c.bf16 %v64_v32, %v63_v31 }
   0xb   :  { %v49_v40 = vld [vmem:[%s2949_s1 + $0xb0] sm:$0xff]  ;;  %v50_v41 = vld [vmem:[%s2949_s1 + $0xb8] sm:$0xff]  ;;  %v2615_v44 = vpack.c.bf16 %v32_v38, %v31_v37  ;;  %v51_v49 = vld [vmem:[%s2949_s1 + $0xc0] sm:$0xff] }
   0xc   :  { %1849 = vmatmul.mubr.msk.f32.vlgmr.msra.gmra.mrb[0].mxu0 %vm75_vm0, %v2519_v20  ;;  %1863 = vmatmul.mubr.msk.f32.vlgmr.msra.gmra.mrb[0].mxu1 %vm75_vm0, %v2524_v21  ;;  %v65_v42 = vld [vmem:[%s2949_s1 + $0x130] sm:$0xff]  ;;  %v66_v43 = vld [vmem:[%s2949_s1 + $0x138] sm:$0xff]  ;;  %v2619_v45 = vpack.c.bf16 %v50_v41, %v49_v40  ;;  %v52_v50 = vld [vmem:[%s2949_s1 + $0xc8] sm:$0xff] }
   0xd   :  { %1851 = vmatprep.mubr.msk.f32.mxu0 %vm75_vm0, %v2529_v22  ;;  %1865 = vmatprep.mubr.msk.f32.mxu1 %vm75_vm0, %v2534_v23  ;;  %v33_v46 = vld [vmem:[%s2949_s1 + $0x30] sm:$0xff]  ;;  %v34_v47 = vld [vmem:[%s2949_s1 + $0x38] sm:$0xff]  ;;  %v2627_v48 = vpack.c.bf16 %v66_v43, %v65_v42  ;;  %v67_v51 = vld [vmem:[%s2949_s1 + $0x140] sm:$0xff]  ;;  %v2647_v54 = vpack.c.bf16 %v52_v50, %v51_v49 }
   0xe   :  { %2123 = vmatpush3.bf16.msra.mxu0 %v2537_v24  ;;  %2155 = vmatpush3.bf16.msra.mxu1 %v2502_v15  ;;  %v68_v52 = vld [vmem:[%s2949_s1 + $0x148] sm:$0xff]  ;;  %v2643_v53 = vpack.c.bf16 %v34_v47, %v33_v46  ;;  %v35_v55 = vld [vmem:[%s2949_s1 + $0x40] sm:$0xff]  ;;  %v53_v58 = vld [vmem:[%s2949_s1 + $0xd0] sm:$0xff] }
   0xf   :  { %2125 = vmatprep.subr.bf16.mxu0 %v2540_v25  ;;  %2157 = vmatprep.subr.bf16.mxu1 %v2548_v28  ;;  %v36_v56 = vld [vmem:[%s2949_s1 + $0x48] sm:$0xff]  ;;  %v2655_v57 = vpack.c.bf16 %v68_v52, %v67_v51  ;;  %v54_v59 = vld [vmem:[%s2949_s1 + $0xd8] sm:$0xff]  ;;  %v69_v60 = vld [vmem:[%s2949_s1 + $0x150] sm:$0xff] }
  0x10   :  { %1852 = vmatmul.mubr.msk.f32.gmra.mrb[2].mxu0 %vm75_vm0, %v2571_v33  ;;  %1866 = vmatmul.mubr.msk.f32.gmra.mrb[2].mxu1 %vm75_vm0, %v2578_v34  ;;  %v70_v61 = vld [vmem:[%s2949_s1 + $0x158] sm:$0xff]  ;;  %v2671_v62 = vpack.c.bf16 %v36_v56, %v35_v55  ;;  %v2675_v63 = vpack.c.bf16 %v54_v59, %v53_v58  ;;  %v55_v8 = vld [vmem:[%s2949_s1 + $0xe0] sm:$0xff]  ;;  %v56_v9 = vld [vmem:[%s2949_s1 + $0xe8] sm:$0xff] }
  0x11   :  { %334 = vmatprep.mubr.f32.mxu0 %v2447_v0  ;;  %v37_v0 = vld [vmem:[%s2949_s1 + $0x50] sm:$0xff]  ;;  %v38_v3 = vld [vmem:[%s2949_s1 + $0x58] sm:$0xff]  ;;  %v2683_v6 = vpack.c.bf16 %v70_v61, %v69_v60  ;;  %v71_v11 = vld [vmem:[%s2949_s1 + $0x160] sm:$0xff]  ;;  %v2703_v14 = vpack.c.bf16 %v56_v9, %v55_v8 }
  0x12   :  { %2127 = vmatpush3.bf16.msra.mxu0 %v2582_v35  ;;  %2159 = vmatpush3.bf16.msra.mxu1 %v2548_v28  ;;  %v72_v12 = vld [vmem:[%s2949_s1 + $0x168] sm:$0xff]  ;;  %v2699_v13 = vpack.c.bf16 %v38_v3, %v37_v0  ;;  %v39_v16 = vld [vmem:[%s2949_s1 + $0x60] sm:$0xff]  ;;  %v57_v19 = vld [vmem:[%s2949_s1 + $0xf0] sm:$0xff] }
  0x13   :  { %2129 = vmatprep.subr.bf16.mxu0 %v2586_v36  ;;  %2161 = vmatprep.subr.bf16.mxu1 %v2594_v39  ;;  %v40_v17 = vld [vmem:[%s2949_s1 + $0x68] sm:$0xff]  ;;  %v2711_v18 = vpack.c.bf16 %v72_v12, %v71_v11  ;;  %v58_v26 = vld [vmem:[%s2949_s1 + $0xf8] sm:$0xff]  ;;  %v41_v30 = vld [vmem:[%s2949_s1 + $0x70] sm:$0xff] }
  0x14   :  { %v2721_v27 = vpack.c.bf16 %v40_v17, %v39_v16  ;;  %v2725_v29 = vpack.c.bf16 %v58_v26, %v57_v19  ;;  %v42_v31 = vld [vmem:[%s2949_s1 + $0x78] sm:$0xff]  ;;  %v73_v37 = vld [vmem:[%s2949_s1 + $0x170] sm:$0xff] }
  0x15   :  { %v2735_v32 = vpack.c.bf16 %v42_v31, %v41_v30  ;;  %v74_v38 = vld [vmem:[%s2949_s1 + $0x178] sm:$0xff] }
  0x16   :  { %2131 = vmatpush3.bf16.msra.mxu0 %v2615_v44  ;;  %2163 = vmatpush3.bf16.msra.mxu1 %v2594_v39  ;;  %v2745_v40 = vpack.c.bf16 %v74_v38, %v73_v37 }
  0x17   :  { %2133 = vmatprep.subr.bf16.mxu0 %v2619_v45  ;;  %2165 = vmatprep.subr.bf16.mxu1 %v2627_v48 }
  0x1a   :  { %2135 = vmatpush3.bf16.msra.mxu0 %v2643_v53  ;;  %2167 = vmatpush3.bf16.msra.mxu1 %v2627_v48 }
  0x1b   :  { %2137 = vmatprep.subr.bf16.mxu0 %v2647_v54  ;;  %2169 = vmatprep.subr.bf16.mxu1 %v2655_v57 }
  0x1e   :  { %2139 = vmatpush3.bf16.msra.mxu0 %v2671_v62  ;;  %2171 = vmatpush3.bf16.msra.mxu1 %v2655_v57 }
  0x1f   :  { %2141 = vmatprep.subr.bf16.mxu0 %v2675_v63  ;;  %2173 = vmatprep.subr.bf16.mxu1 %v2683_v6 }
  0x22   :  { %2143 = vmatpush3.bf16.msra.mxu0 %v2699_v13  ;;  %2175 = vmatpush3.bf16.msra.mxu1 %v2683_v6 }
  0x23   :  { %2145 = vmatprep.subr.bf16.mxu0 %v2703_v14  ;;  %2177 = vmatprep.subr.bf16.mxu1 %v2711_v18 }
  0x26   :  { %2147 = vmatpush3.bf16.msra.mxu0 %v2721_v27  ;;  %2179 = vmatpush3.bf16.msra.mxu1 %v2711_v18 }
  0x27   :  { %2149 = vmatprep.subr.bf16.mxu0 %v2725_v29  ;;  %2181 = vmatprep.subr.bf16.mxu1 %v2745_v40 }
  0x2a   :  { %2151 = vmatpush3.bf16.msra.mxu0 %v2735_v32  ;;  %2183 = vmatpush3.bf16.msra.mxu1 %v2745_v40 }
  0xdf   :  { %v1850_v41 = vpop.f32.mrb[0].mxu0  ;;  %v1864_v42 = vpop.f32.mrb[0].mxu1 }
  0xe0   :  { %v154_v43 = vpop.f32.mrb[1].mxu0  ;;  %v251_v46 = vpop.f32.mrb[1].mxu1 }
  0xe1   :  { %335 = vmatmul.mubr.f32.vlgmr.msra.gmra.mrb[4].mxu0 %v154_v43  ;;  %1900 = vmatprep.mubr.f32.mxu1 %v251_v46 }
  0xe2   :  { %1901 = vmatmul.mubr.f32.vlgmr.msra.gmra.mrb[4].mxu1 %v1864_v42  ;;  %339 = vmatprep.mubr.f32.mxu0 %v2452_v1 }
  0xe3   :  { %v1853_v47 = vpop.f32.mrb[2].mxu0  ;;  %v1867_v49 = vpop.f32.mrb[2].mxu1 }
  0xe4   :  { %v164_v50 = vpop.f32.mrb[3].mxu0  ;;  %v261_v51 = vpop.f32.mrb[3].mxu1 }
  0xe5   :  { %340 = vmatmul.mubr.f32.gmra.mrb[6].mxu0 %v1850_v41  ;;  %1903 = vmatprep.mubr.f32.mxu1 %v261_v51 }
  0xe6   :  { %344 = vmatprep.mubr.f32.mxu0 %v2457_v2  ;;  %1904 = vmatmul.mubr.f32.gmra.mrb[6].mxu1 %v1867_v49 }
  0xe7   :  { %1914 = vmatprep.mubr.msk.f32.mxu1 %vm75_vm0, %v2469_v5 }
  0xe9   :  { %345 = vmatmul.mubr.f32.gmra.mrb[8].mxu0 %v164_v50 }
  0xea   :  { %349 = vmatprep.mubr.f32.mxu0 %v2464_v4 }
  0xed   :  { %350 = vmatmul.mubr.f32.gmra.mrb[10].mxu0 %v1853_v47 }
  0xee   :  { %1928 = vmatprep.mubr.msk.f32.mxu0 %vm75_vm0, %v2478_v7 }
 0x1b4   :  { %v1568_v1 = vpop.f32.mrb[4].mxu0 }
 0x1b5   :  { %v1569_v52 = vpop.f32.mrb[5].mxu0  ;;  %v1902_v55 = vpop.f32.mrb[4].mxu1 }
 0x1b6   :  { %v1570_v56 = vadd.f32 %v1569_v52, %v1568_v1  ;;  %v421_v58 = vpop.f32.mrb[5].mxu1 }
 0x1b8   :  { %v422_v59 = vadd.f32 %v1570_v56, %v421_v58  ;;  %v1571_v60 = vpop.f32.mrb[6].mxu0 }
 0x1b9   :  { %v1572_v61 = vpop.f32.mrb[7].mxu0  ;;  %v1905_v2 = vpop.f32.mrb[6].mxu1 }
 0x1ba   :  { %v1573_v0 = vadd.f32 %v1572_v61, %v1571_v60  ;;  %v431_v3 = vpop.f32.mrb[7].mxu1  ;;  %v440_v4 = vmax.f32 %v422_v59, 0.0 }
 0x1bc   :  { %v2756_v8 = vadd.f32 %v1902_v55, %v1573_v0  ;;  %v1574_v9 = vpop.f32.mrb[8].mxu0 }
 0x1bd   :  { %v1575_v11 = vpop.f32.mrb[9].mxu0 }
 0x1be   :  { %v441_v12 = vmax.f32 %v2756_v8, 0.0  ;;  %v1576_v16 = vadd.f32 %v1575_v11, %v1574_v9 }
 0x1c0   :  { %v2184_v17 = vpack.c.bf16 %v441_v12, %v440_v4  ;;  %v2761_v19 = vadd.f32 %v1576_v16, %v431_v3  ;;  %v1577_v26 = vpop.f32.mrb[10].mxu0 }
 0x1c1   :  { %v1578_v30 = vpop.f32.mrb[11].mxu0 }
 0x1c2   :  { %v1579_v31 = vadd.f32 %v1578_v30, %v1577_v26  ;;  %2185 = vmatprep.subr.bf16.mxu1 %v2184_v17  ;;  %2193 = vmatprep.subr.bf16.mxu0 %v2184_v17  ;;  %v442_v38 = vmax.f32 %v2761_v19, 0.0 }
 0x1c3   :  { %2187 = vmatpush3.bf16.msra.mxu1 %v2184_v17  ;;  %2195 = vmatpush3.bf16.msra.mxu0 %v2184_v17 }
 0x1c4   :  { %v2763_v37 = vadd.f32 %v1905_v2, %v1579_v31 }
 0x1c6   :  { %v443_v41 = vmax.f32 %v2763_v37, 0.0 }
 0x1c8   :  { %v2188_v42 = vpack.c.bf16 %v443_v41, %v442_v38 }
 0x1ca   :  { %2189 = vmatprep.subr.bf16.mxu1 %v2188_v42  ;;  %2197 = vmatprep.subr.bf16.mxu0 %v2188_v42 }
 0x1cb   :  { %2191 = vmatpush3.bf16.msra.mxu1 %v2188_v42  ;;  %2199 = vmatpush3.bf16.msra.mxu0 %v2188_v42 }
 0x1cc   :  { %2201 = vmatprep.subr.bf16.mxu1 %v2486_v10  ;;  %2233 = vmatprep.subr.bf16.mxu0 %v2502_v15 }
 0x1ce   :  { %1915 = vmatmul.mubr.msk.f32.vlgmr.msra.gmra.mrb[8].mxu1 %vm75_vm0, %v2519_v20  ;;  %1929 = vmatmul.mubr.msk.f32.vlgmr.msra.gmra.mrb[12].mxu0 %vm75_vm0, %v2524_v21 }
 0x1cf   :  { %1917 = vmatprep.mubr.msk.f32.mxu1 %vm75_vm0, %v2529_v22  ;;  %1931 = vmatprep.mubr.msk.f32.mxu0 %vm75_vm0, %v2534_v23 }
 0x1d0   :  { %2203 = vmatpush3.bf16.msra.mxu1 %v2537_v24  ;;  %2235 = vmatpush3.bf16.msra.mxu0 %v2502_v15 }
 0x1d1   :  { %2205 = vmatprep.subr.bf16.mxu1 %v2540_v25  ;;  %2237 = vmatprep.subr.bf16.mxu0 %v2548_v28 }
 0x1d2   :  { %1918 = vmatmul.mubr.msk.f32.gmra.mrb[10].mxu1 %vm75_vm0, %v2571_v33  ;;  %1932 = vmatmul.mubr.msk.f32.gmra.mrb[14].mxu0 %vm75_vm0, %v2578_v34 }
 0x1d3   :  { %678 = vmatprep.mubr.f32.mxu1 %v440_v4 }
 0x1d4   :  { %2207 = vmatpush3.bf16.msra.mxu1 %v2582_v35  ;;  %2239 = vmatpush3.bf16.msra.mxu0 %v2548_v28 }
 0x1d5   :  { %2209 = vmatprep.subr.bf16.mxu1 %v2586_v36  ;;  %2241 = vmatprep.subr.bf16.mxu0 %v2594_v39 }
 0x1d8   :  { %2211 = vmatpush3.bf16.msra.mxu1 %v2615_v44  ;;  %2243 = vmatpush3.bf16.msra.mxu0 %v2594_v39 }
 0x1d9   :  { %2213 = vmatprep.subr.bf16.mxu1 %v2619_v45  ;;  %2245 = vmatprep.subr.bf16.mxu0 %v2627_v48 }
 0x1dc   :  { %2215 = vmatpush3.bf16.msra.mxu1 %v2643_v53  ;;  %2247 = vmatpush3.bf16.msra.mxu0 %v2627_v48 }
 0x1dd   :  { %2217 = vmatprep.subr.bf16.mxu1 %v2647_v54  ;;  %2249 = vmatprep.subr.bf16.mxu0 %v2655_v57 }
 0x1e0   :  { %2219 = vmatpush3.bf16.msra.mxu1 %v2671_v62  ;;  %2251 = vmatpush3.bf16.msra.mxu0 %v2655_v57 }
 0x1e1   :  { %2221 = vmatprep.subr.bf16.mxu1 %v2675_v63  ;;  %2253 = vmatprep.subr.bf16.mxu0 %v2683_v6 }
 0x1e4   :  { %2223 = vmatpush3.bf16.msra.mxu1 %v2699_v13  ;;  %2255 = vmatpush3.bf16.msra.mxu0 %v2683_v6 }
 0x1e5   :  { %2225 = vmatprep.subr.bf16.mxu1 %v2703_v14  ;;  %2257 = vmatprep.subr.bf16.mxu0 %v2711_v18 }
 0x1e8   :  { %2227 = vmatpush3.bf16.msra.mxu1 %v2721_v27  ;;  %2259 = vmatpush3.bf16.msra.mxu0 %v2711_v18 }
 0x1e9   :  { %2229 = vmatprep.subr.bf16.mxu1 %v2725_v29  ;;  %2261 = vmatprep.subr.bf16.mxu0 %v2745_v40 }
 0x1ec   :  { %2231 = vmatpush3.bf16.msra.mxu1 %v2735_v32  ;;  %2263 = vmatpush3.bf16.msra.mxu0 %v2745_v40 }
 0x2a1   :  { %v1916_v43 = vpop.f32.mrb[8].mxu1  ;;  %v1930_v46 = vpop.f32.mrb[12].mxu0 }
 0x2a2   :  { %v510_v47 = vpop.f32.mrb[9].mxu1  ;;  %v595_v49 = vpop.f32.mrb[13].mxu0 }
 0x2a3   :  { %679 = vmatmul.mubr.f32.vlgmr.msra.gmra.mrb[12].mxu1 %v510_v47  ;;  %1966 = vmatprep.mubr.f32.mxu0 %v595_v49 }
 0x2a4   :  { %683 = vmatprep.mubr.f32.mxu1 %v441_v12  ;;  %1967 = vmatmul.mubr.f32.vlgmr.msra.gmra.mrb[16].mxu0 %v1930_v46 }
 0x2a5   :  { %v1919_v50 = vpop.f32.mrb[10].mxu1  ;;  %v1933_v51 = vpop.f32.mrb[14].mxu0 }
 0x2a6   :  { %v520_v1 = vpop.f32.mrb[11].mxu1  ;;  %v605_v52 = vpop.f32.mrb[15].mxu0 }
 0x2a7   :  { %684 = vmatmul.mubr.f32.gmra.mrb[14].mxu1 %v1916_v43  ;;  %1969 = vmatprep.mubr.f32.mxu0 %v605_v52 }
 0x2a8   :  { %688 = vmatprep.mubr.f32.mxu1 %v442_v38  ;;  %1970 = vmatmul.mubr.f32.gmra.mrb[18].mxu0 %v1933_v51 }
 0x2a9   :  { %1980 = vmatprep.mubr.msk.f32.mxu0 %vm75_vm0, %v2469_v5 }
 0x2ab   :  { %689 = vmatmul.mubr.f32.gmra.mrb[16].mxu1 %v520_v1 }
 0x2ac   :  { %693 = vmatprep.mubr.f32.mxu1 %v443_v41 }
 0x2af   :  { %694 = vmatmul.mubr.f32.gmra.mrb[18].mxu1 %v1919_v50 }
 0x2b0   :  { %1994 = vmatprep.mubr.msk.f32.mxu1 %vm75_vm0, %v2478_v7 }
 0x376   :  { %v1648_v55 = vpop.f32.mrb[12].mxu1 }
 0x377   :  { %v1649_v56 = vpop.f32.mrb[13].mxu1  ;;  %v1968_v58 = vpop.f32.mrb[16].mxu0 }
 0x378   :  { %v1650_v59 = vadd.f32 %v1649_v56, %v1648_v55  ;;  %v765_v60 = vpop.f32.mrb[17].mxu0 }
 0x37a   :  { %v766_v61 = vadd.f32 %v1650_v59, %v765_v60  ;;  %v1651_v2 = vpop.f32.mrb[14].mxu1 }
 0x37b   :  { %v1652_v0 = vpop.f32.mrb[15].mxu1  ;;  %v1971_v3 = vpop.f32.mrb[18].mxu0 }
 0x37c   :  { %v1653_v8 = vadd.f32 %v1652_v0, %v1651_v2  ;;  %v775_v9 = vpop.f32.mrb[19].mxu0  ;;  %v784_v16 = vmax.f32 %v766_v61, 0.0 }
 0x37e   :  { %v2817_v11 = vadd.f32 %v1968_v58, %v1653_v8  ;;  %v1654_v4 = vpop.f32.mrb[16].mxu1 }
 0x37f   :  { %v1655_v12 = vpop.f32.mrb[17].mxu1 }
 0x380   :  { %v785_v17 = vmax.f32 %v2817_v11, 0.0  ;;  %v1656_v19 = vadd.f32 %v1655_v12, %v1654_v4 }
 0x382   :  { %v2264_v26 = vpack.c.bf16 %v785_v17, %v784_v16  ;;  %v2822_v30 = vadd.f32 %v1656_v19, %v775_v9  ;;  %v1657_v31 = vpop.f32.mrb[18].mxu1 }
 0x383   :  { %v1658_v37 = vpop.f32.mrb[19].mxu1 }
 0x384   :  { %v1659_v38 = vadd.f32 %v1658_v37, %v1657_v31  ;;  %2265 = vmatprep.subr.bf16.mxu0 %v2264_v26  ;;  %2273 = vmatprep.subr.bf16.mxu1 %v2264_v26  ;;  %v786_v42 = vmax.f32 %v2822_v30, 0.0 }
 0x385   :  { %2267 = vmatpush3.bf16.msra.mxu0 %v2264_v26  ;;  %2275 = vmatpush3.bf16.msra.mxu1 %v2264_v26 }
 0x386   :  { %v2824_v41 = vadd.f32 %v1971_v3, %v1659_v38 }
 0x388   :  { %v787_v43 = vmax.f32 %v2824_v41, 0.0 }
 0x38a   :  { %v2268_v46 = vpack.c.bf16 %v787_v43, %v786_v42 }
 0x38c   :  { %2269 = vmatprep.subr.bf16.mxu0 %v2268_v46  ;;  %2277 = vmatprep.subr.bf16.mxu1 %v2268_v46 }
 0x38d   :  { %2271 = vmatpush3.bf16.msra.mxu0 %v2268_v46  ;;  %2279 = vmatpush3.bf16.msra.mxu1 %v2268_v46 }
 0x38e   :  { %2281 = vmatprep.subr.bf16.mxu0 %v2486_v10  ;;  %2313 = vmatprep.subr.bf16.mxu1 %v2502_v15 }
 0x390   :  { %1981 = vmatmul.mubr.msk.f32.vlgmr.msra.gmra.mrb[20].mxu0 %vm75_vm0, %v2519_v20  ;;  %1995 = vmatmul.mubr.msk.f32.vlgmr.msra.gmra.mrb[20].mxu1 %vm75_vm0, %v2524_v21 }
 0x391   :  { %1983 = vmatprep.mubr.msk.f32.mxu0 %vm75_vm0, %v2529_v22  ;;  %1997 = vmatprep.mubr.msk.f32.mxu1 %vm75_vm0, %v2534_v23 }
 0x392   :  { %2283 = vmatpush3.bf16.msra.mxu0 %v2537_v24  ;;  %2315 = vmatpush3.bf16.msra.mxu1 %v2502_v15 }
 0x393   :  { %2285 = vmatprep.subr.bf16.mxu0 %v2540_v25  ;;  %2317 = vmatprep.subr.bf16.mxu1 %v2548_v28 }
 0x394   :  { %1984 = vmatmul.mubr.msk.f32.gmra.mrb[22].mxu0 %vm75_vm0, %v2571_v33  ;;  %1998 = vmatmul.mubr.msk.f32.gmra.mrb[22].mxu1 %vm75_vm0, %v2578_v34 }
 0x395   :  { %1022 = vmatprep.mubr.f32.mxu0 %v784_v16 }
 0x396   :  { %2287 = vmatpush3.bf16.msra.mxu0 %v2582_v35  ;;  %2319 = vmatpush3.bf16.msra.mxu1 %v2548_v28 }
 0x397   :  { %2289 = vmatprep.subr.bf16.mxu0 %v2586_v36  ;;  %2321 = vmatprep.subr.bf16.mxu1 %v2594_v39 }
 0x39a   :  { %2291 = vmatpush3.bf16.msra.mxu0 %v2615_v44  ;;  %2323 = vmatpush3.bf16.msra.mxu1 %v2594_v39 }
 0x39b   :  { %2293 = vmatprep.subr.bf16.mxu0 %v2619_v45  ;;  %2325 = vmatprep.subr.bf16.mxu1 %v2627_v48 }
 0x39e   :  { %2295 = vmatpush3.bf16.msra.mxu0 %v2643_v53  ;;  %2327 = vmatpush3.bf16.msra.mxu1 %v2627_v48 }
 0x39f   :  { %2297 = vmatprep.subr.bf16.mxu0 %v2647_v54  ;;  %2329 = vmatprep.subr.bf16.mxu1 %v2655_v57 }
 0x3a2   :  { %2299 = vmatpush3.bf16.msra.mxu0 %v2671_v62  ;;  %2331 = vmatpush3.bf16.msra.mxu1 %v2655_v57 }
 0x3a3   :  { %2301 = vmatprep.subr.bf16.mxu0 %v2675_v63  ;;  %2333 = vmatprep.subr.bf16.mxu1 %v2683_v6 }
 0x3a6   :  { %2303 = vmatpush3.bf16.msra.mxu0 %v2699_v13  ;;  %2335 = vmatpush3.bf16.msra.mxu1 %v2683_v6 }
 0x3a7   :  { %2305 = vmatprep.subr.bf16.mxu0 %v2703_v14  ;;  %2337 = vmatprep.subr.bf16.mxu1 %v2711_v18 }
 0x3aa   :  { %2307 = vmatpush3.bf16.msra.mxu0 %v2721_v27  ;;  %2339 = vmatpush3.bf16.msra.mxu1 %v2711_v18 }
 0x3ab   :  { %2309 = vmatprep.subr.bf16.mxu0 %v2725_v29  ;;  %2341 = vmatprep.subr.bf16.mxu1 %v2745_v40 }
 0x3ae   :  { %2311 = vmatpush3.bf16.msra.mxu0 %v2735_v32  ;;  %2343 = vmatpush3.bf16.msra.mxu1 %v2745_v40 }
 0x463   :  { %v1982_v47 = vpop.f32.mrb[20].mxu0  ;;  %v1996_v49 = vpop.f32.mrb[20].mxu1 }
 0x464   :  { %v854_v50 = vpop.f32.mrb[21].mxu0  ;;  %v939_v51 = vpop.f32.mrb[21].mxu1 }
 0x465   :  { %1023 = vmatmul.mubr.f32.vlgmr.msra.gmra.mrb[24].mxu0 %v854_v50  ;;  %2032 = vmatprep.mubr.f32.mxu1 %v939_v51 }
 0x466   :  { %1027 = vmatprep.mubr.f32.mxu0 %v785_v17  ;;  %2033 = vmatmul.mubr.f32.vlgmr.msra.gmra.mrb[24].mxu1 %v1996_v49 }
 0x467   :  { %v1985_v1 = vpop.f32.mrb[22].mxu0  ;;  %v1999_v52 = vpop.f32.mrb[22].mxu1 }
 0x468   :  { %v864_v55 = vpop.f32.mrb[23].mxu0  ;;  %v949_v56 = vpop.f32.mrb[23].mxu1 }
 0x469   :  { %1028 = vmatmul.mubr.f32.gmra.mrb[26].mxu0 %v1982_v47  ;;  %2035 = vmatprep.mubr.f32.mxu1 %v949_v56 }
 0x46a   :  { %1032 = vmatprep.mubr.f32.mxu0 %v786_v42  ;;  %2036 = vmatmul.mubr.f32.gmra.mrb[26].mxu1 %v1999_v52 }
 0x46b   :  { %2046 = vmatprep.mubr.msk.f32.mxu1 %vm75_vm0, %v2469_v5 }
 0x46d   :  { %1033 = vmatmul.mubr.f32.gmra.mrb[28].mxu0 %v864_v55 }
 0x46e   :  { %1037 = vmatprep.mubr.f32.mxu0 %v787_v43 }
 0x471   :  { %1038 = vmatmul.mubr.f32.gmra.mrb[30].mxu0 %v1985_v1 }
 0x472   :  { %2060 = vmatprep.mubr.msk.f32.mxu0 %vm75_vm0, %v2478_v7 }
 0x538   :  { %v1728_v58 = vpop.f32.mrb[24].mxu0 }
 0x539   :  { %v1729_v59 = vpop.f32.mrb[25].mxu0  ;;  %v2034_v60 = vpop.f32.mrb[24].mxu1 }
 0x53a   :  { %v1730_v61 = vadd.f32 %v1729_v59, %v1728_v58  ;;  %v1109_v2 = vpop.f32.mrb[25].mxu1 }
 0x53c   :  { %v1110_v0 = vadd.f32 %v1730_v61, %v1109_v2  ;;  %v1731_v3 = vpop.f32.mrb[26].mxu0 }
 0x53d   :  { %v1732_v8 = vpop.f32.mrb[27].mxu0  ;;  %v2037_v9 = vpop.f32.mrb[26].mxu1 }
 0x53e   :  { %v1733_v11 = vadd.f32 %v1732_v8, %v1731_v3  ;;  %v1119_v4 = vpop.f32.mrb[27].mxu1  ;;  %v1128_v17 = vmax.f32 %v1110_v0, 0.0 }
 0x540   :  { %v2878_v12 = vadd.f32 %v2034_v60, %v1733_v11  ;;  %v1734_v5 = vpop.f32.mrb[28].mxu0 }
 0x541   :  { %v1735_v16 = vpop.f32.mrb[29].mxu0 }
 0x542   :  { %v1129_v19 = vmax.f32 %v2878_v12, 0.0  ;;  %v1736_v26 = vadd.f32 %v1735_v16, %v1734_v5 }
 0x544   :  { %v2344_v7 = vpack.c.bf16 %v1129_v19, %v1128_v17  ;;  %v2883_v30 = vadd.f32 %v1736_v26, %v1119_v4  ;;  %v1737_v31 = vpop.f32.mrb[30].mxu0 }
 0x545   :  { %v1738_v37 = vpop.f32.mrb[31].mxu0 }
 0x546   :  { %v1739_v38 = vadd.f32 %v1738_v37, %v1737_v31  ;;  %2345 = vmatprep.subr.bf16.mxu1 %v2344_v7  ;;  %2353 = vmatprep.subr.bf16.mxu0 %v2344_v7  ;;  %v1130_v42 = vmax.f32 %v2883_v30, 0.0 }
 0x547   :  { %2347 = vmatpush3.bf16.msra.mxu1 %v2344_v7  ;;  %2355 = vmatpush3.bf16.msra.mxu0 %v2344_v7 }
 0x548   :  { %v2885_v41 = vadd.f32 %v2037_v9, %v1739_v38 }
 0x54a   :  { %v1131_v43 = vmax.f32 %v2885_v41, 0.0 }
 0x54c   :  { %v2348_v46 = vpack.c.bf16 %v1131_v43, %v1130_v42 }
 0x54e   :  { %2349 = vmatprep.subr.bf16.mxu1 %v2348_v46  ;;  %2357 = vmatprep.subr.bf16.mxu0 %v2348_v46 }
 0x54f   :  { %2351 = vmatpush3.bf16.msra.mxu1 %v2348_v46  ;;  %2359 = vmatpush3.bf16.msra.mxu0 %v2348_v46 }
 0x550   :  { %2361 = vmatprep.subr.bf16.mxu1 %v2486_v10  ;;  %2393 = vmatprep.subr.bf16.mxu0 %v2502_v15 }
 0x552   :  { %2047 = vmatmul.mubr.msk.f32.vlgmr.msra.gmra.mrb[28].mxu1 %vm75_vm0, %v2519_v20  ;;  %2061 = vmatmul.mubr.msk.f32.vlgmr.msra.gmra.mrb[32].mxu0 %vm75_vm0, %v2524_v21 }
 0x553   :  { %2049 = vmatprep.mubr.msk.f32.mxu1 %vm75_vm0, %v2529_v22  ;;  %2063 = vmatprep.mubr.msk.f32.mxu0 %vm75_vm0, %v2534_v23 }
 0x554   :  { %2363 = vmatpush3.bf16.msra.mxu1 %v2537_v24  ;;  %2395 = vmatpush3.bf16.msra.mxu0 %v2502_v15 }
 0x555   :  { %2365 = vmatprep.subr.bf16.mxu1 %v2540_v25  ;;  %2397 = vmatprep.subr.bf16.mxu0 %v2548_v28 }
 0x556   :  { %2050 = vmatmul.mubr.msk.f32.gmra.mrb[30].mxu1 %vm75_vm0, %v2571_v33  ;;  %2064 = vmatmul.mubr.msk.f32.gmra.mrb[34].mxu0 %vm75_vm0, %v2578_v34 }
 0x557   :  { %1366 = vmatprep.mubr.f32.mxu1 %v1128_v17 }
 0x558   :  { %2367 = vmatpush3.bf16.msra.mxu1 %v2582_v35  ;;  %2399 = vmatpush3.bf16.msra.mxu0 %v2548_v28 }
 0x559   :  { %2369 = vmatprep.subr.bf16.mxu1 %v2586_v36  ;;  %2401 = vmatprep.subr.bf16.mxu0 %v2594_v39 }
 0x55c   :  { %2371 = vmatpush3.bf16.msra.mxu1 %v2615_v44  ;;  %2403 = vmatpush3.bf16.msra.mxu0 %v2594_v39 }
 0x55d   :  { %2373 = vmatprep.subr.bf16.mxu1 %v2619_v45  ;;  %2405 = vmatprep.subr.bf16.mxu0 %v2627_v48 }
 0x560   :  { %2375 = vmatpush3.bf16.msra.mxu1 %v2643_v53  ;;  %2407 = vmatpush3.bf16.msra.mxu0 %v2627_v48 }
 0x561   :  { %2377 = vmatprep.subr.bf16.mxu1 %v2647_v54  ;;  %2409 = vmatprep.subr.bf16.mxu0 %v2655_v57 }
 0x564   :  { %2379 = vmatpush3.bf16.msra.mxu1 %v2671_v62  ;;  %2411 = vmatpush3.bf16.msra.mxu0 %v2655_v57 }
 0x565   :  { %2381 = vmatprep.subr.bf16.mxu1 %v2675_v63  ;;  %2413 = vmatprep.subr.bf16.mxu0 %v2683_v6 }
 0x568   :  { %2383 = vmatpush3.bf16.msra.mxu1 %v2699_v13  ;;  %2415 = vmatpush3.bf16.msra.mxu0 %v2683_v6 }
 0x569   :  { %2385 = vmatprep.subr.bf16.mxu1 %v2703_v14  ;;  %2417 = vmatprep.subr.bf16.mxu0 %v2711_v18 }
 0x56c   :  { %2387 = vmatpush3.bf16.msra.mxu1 %v2721_v27  ;;  %2419 = vmatpush3.bf16.msra.mxu0 %v2711_v18 }
 0x56d   :  { %2389 = vmatprep.subr.bf16.mxu1 %v2725_v29  ;;  %2421 = vmatprep.subr.bf16.mxu0 %v2745_v40 }
 0x570   :  { %2391 = vmatpush3.bf16.msra.mxu1 %v2735_v32  ;;  %2423 = vmatpush3.bf16.msra.mxu0 %v2745_v40 }
 0x625   :  { %v2048_v10 = vpop.f32.mrb[28].mxu1  ;;  %v2062_v15 = vpop.f32.mrb[32].mxu0 }
 0x626   :  { %v1198_v20 = vpop.f32.mrb[29].mxu1  ;;  %v1283_v21 = vpop.f32.mrb[33].mxu0 }
 0x627   :  { %1367 = vmatmul.mubr.f32.vlgmr.msra.gmra.mrb[32].mxu1 %v1198_v20  ;;  %2098 = vmatprep.mubr.f32.mxu0 %v1283_v21 }
 0x628   :  { %1371 = vmatprep.mubr.f32.mxu1 %v1129_v19  ;;  %2099 = vmatmul.mubr.f32.vlgmr.msra.gmra.mrb[36].mxu0 %v2062_v15 }
 0x629   :  { %v2051_v22 = vpop.f32.mrb[30].mxu1  ;;  %v2065_v23 = vpop.f32.mrb[34].mxu0 }
 0x62a   :  { %v1208_v24 = vpop.f32.mrb[31].mxu1  ;;  %v1293_v25 = vpop.f32.mrb[35].mxu0 }
 0x62b   :  { %1372 = vmatmul.mubr.f32.gmra.mrb[34].mxu1 %v2048_v10  ;;  %2101 = vmatprep.mubr.f32.mxu0 %v1293_v25 }
 0x62c   :  { %1376 = vmatprep.mubr.f32.mxu1 %v1130_v42  ;;  %2102 = vmatmul.mubr.f32.gmra.mrb[38].mxu0 %v2065_v23 }
 0x62f   :  { %1377 = vmatmul.mubr.f32.gmra.mrb[36].mxu1 %v1208_v24 }
 0x630   :  { %1381 = vmatprep.mubr.f32.mxu1 %v1131_v43 }
 0x633   :  { %1382 = vmatmul.mubr.f32.gmra.mrb[38].mxu1 %v2051_v22 }
 0x6fa   :  { %v1808_v28 = vpop.f32.mrb[32].mxu1 }
 0x6fb   :  { %v1809_v33 = vpop.f32.mrb[33].mxu1  ;;  %v2100_v34 = vpop.f32.mrb[36].mxu0 }
 0x6fc   :  { %v1810_v35 = vadd.f32 %v1809_v33, %v1808_v28  ;;  %v1453_v36 = vpop.f32.mrb[37].mxu0 }
 0x6fe   :  { %v1454_v39 = vadd.f32 %v1810_v35, %v1453_v36  ;;  %v1811_v44 = vpop.f32.mrb[34].mxu1 }
 0x6ff   :  { %v1812_v45 = vpop.f32.mrb[35].mxu1  ;;  %v2103_v48 = vpop.f32.mrb[38].mxu0 }
 0x700   :  { %v1472_v53 = vmax.f32 %v1454_v39, 0.0  ;;  %v1813_v54 = vadd.f32 %v1812_v45, %v1811_v44  ;;  %v1463_v57 = vpop.f32.mrb[39].mxu0 }
 0x702   :  { %1476 = vst [vmem:[%s2950_s3] sm:$0xff] %v1472_v53  ;;  %v1459_v62 = vadd.f32 %v2100_v34, %v1813_v54  ;;  %v1814_v63 = vpop.f32.mrb[36].mxu1 }
 0x703   :  { %v1815_v6 = vpop.f32.mrb[37].mxu1 }
 0x704   :  { %v1473_v13 = vmax.f32 %v1459_v62, 0.0  ;;  %v1816_v14 = vadd.f32 %v1815_v6, %v1814_v63 }
 0x706   :  { %1477 = vst [vmem:[%s2950_s3 + $0x8] sm:$0xff] %v1473_v13  ;;  %v1464_v18 = vadd.f32 %v1816_v14, %v1463_v57  ;;  %v1817_v27 = vpop.f32.mrb[38].mxu1 }
 0x707   :  { %v1818_v29 = vpop.f32.mrb[39].mxu1 }
 0x708   :  { %v1474_v32 = vmax.f32 %v1464_v18, 0.0  ;;  %v1819_v40 = vadd.f32 %v1818_v29, %v1817_v27 }
 0x70a   :  { %1478 = vst [vmem:[%s2950_s3 + $0x10] sm:$0xff] %v1474_v32  ;;  %v1469_v47 = vadd.f32 %v2103_v48, %v1819_v40 }
 0x70c   :  { %v1475_v49 = vmax.f32 %v1469_v47, 0.0 }
 0x70e   :  { %1479 = vst [vmem:[%s2950_s3 + $0x18] sm:$0xff] %v1475_v49 }

</bundles_post_ra>
